<compile_context>
chip_gen: v7x
topology: tpu7x:2x2x1
jax: 0.10.0
libtpu: 0.0.40
codegen_flags: <defaults>
</compile_context>

<pallas_src>
import jax
import jax.numpy as jnp
from jax.experimental import pallas as pl
from jax.experimental.pallas import tpu as pltpu


def _vae_classifier_kernel(
    x_ref,      # (TB, Dp)     bf16  flattened input tile
    eps_ref,    # (TB, Lp)     f32   reparameterization noise tile
    w1_ref,     # (Dp, Hp)     bf16  encoder hidden weight
    b1_ref,     # (1, Hp)      f32
    wml_ref,    # (Hp, 2*Lp)   f32   fused [Wmu | Wlv]
    bml_ref,    # (1, 2*Lp)    f32   fused [bmu | blv]
    wc1_ref,    # (Lp, C1p)    f32
    bc1_ref,    # (1, C1p)     f32
    wc2_ref,    # (C1p, Cp)    f32
    bc2_ref,    # (1, Cp)      f32   padded class columns hold -1e30
    out_ref,    # (TB, Cp)     f32   softmax probabilities (lane-dense)
):
    lp = eps_ref.shape[1]

    # ---- encoder.encode(x): bf16 matmul, f32 accumulate ----
    h = jnp.dot(x_ref[...], w1_ref[...], preferred_element_type=jnp.float32)
    h = jnp.maximum(h + b1_ref[...], 0.0)

    # ---- fused mu | logvar projection (one wide MXU pass) ----
    ml = jnp.dot(h, wml_ref[...], preferred_element_type=jnp.float32) + bml_ref[...]
    mu = ml[:, :lp]        # vreg-aligned halves (lp is a multiple of 128)
    logvar = ml[:, lp:]

    # ---- encoder.reparameterize(mu, logvar) ----
    z = mu + eps_ref[...] * jnp.exp(0.5 * logvar)

    # ---- classifier: Linear -> ReLU -> Linear -> Softmax(dim=1) ----
    c1 = jnp.dot(z, wc1_ref[...], preferred_element_type=jnp.float32) + bc1_ref[...]
    c1 = jnp.maximum(c1, 0.0)
    logits = jnp.dot(c1, wc2_ref[...], preferred_element_type=jnp.float32) + bc2_ref[...]

    m = jnp.max(logits, axis=-1, keepdims=True)
    e = jnp.exp(logits - m)
    denom = jnp.sum(e, axis=-1, keepdims=True)
    out_ref[...] = e * pl.reciprocal(denom, approx=True)


def _round_up(n, m):
    return ((n + m - 1) // m) * m


def _pad2(a, rows, cols, fill=0.0):
    a = a.astype(jnp.float32)
    return jnp.pad(a, ((0, rows - a.shape[0]), (0, cols - a.shape[1])),
                   constant_values=fill)


def vae_classifier_forward(x_nchw, params, eps, *, batch_tile=None):
    """x_nchw: (B, C, H, W). Returns (B, num_classes) softmax probs (f32)."""
    (w1, b1, wmu, bmu, wlv, blv, wc1, bc1, wc2, bc2) = params

    B = x_nchw.shape[0]
    x_flat = x_nchw.reshape(B, -1).astype(jnp.float32)
    D = x_flat.shape[1]
    H = w1.shape[1]
    L = wmu.shape[1]
    C1 = wc1.shape[1]
    C = wc2.shape[1]

    LANE, SUB = 128, 8
    Dp = _round_up(D, LANE)
    Hp = _round_up(H, LANE)
    Lp = _round_up(L, LANE)
    C1p = _round_up(C1, LANE)
    Cp = _round_up(C, LANE)

    if batch_tile is None:
        batch_tile = 128 if B >= 128 else _round_up(B, SUB)
    TB = batch_tile
    Bp = _round_up(B, TB)

    NEG = -1e30  # padded class logits -> exp() == 0 in the softmax

    # Padded operands. Padded hidden/latent columns have zero weights and
    # biases so they are inert; padded eps columns are zero so z_pad == 0.
    x_p = _pad2(x_flat, Bp, Dp).astype(jnp.bfloat16)
    eps_p = _pad2(eps, Bp, Lp)
    w1_p = _pad2(w1, Dp, Hp).astype(jnp.bfloat16)
    b1_p = _pad2(b1, 1, Hp)
    wml_p = jnp.concatenate([_pad2(wmu, Hp, Lp), _pad2(wlv, Hp, Lp)], axis=1)
    bml_p = jnp.concatenate([_pad2(bmu, 1, Lp), _pad2(blv, 1, Lp)], axis=1)
    wc1_p = _pad2(wc1, Lp, C1p)
    bc1_p = _pad2(bc1, 1, C1p)
    wc2_p = _pad2(wc2, C1p, Cp)
    bc2_p = jnp.pad(bc2.astype(jnp.float32), ((0, 0), (0, Cp - C)),
                    constant_values=NEG)

    grid = (Bp // TB,)

    def batch_map(i):
        return (i, 0)

    def const_map(i):
        return (0, 0)

    in_specs = [
        pl.BlockSpec((TB, Dp), batch_map),       # x
        pl.BlockSpec((TB, Lp), batch_map),       # eps
        pl.BlockSpec((Dp, Hp), const_map),       # W1 (resident)
        pl.BlockSpec((1, Hp), const_map),        # b1
        pl.BlockSpec((Hp, 2 * Lp), const_map),   # [Wmu | Wlv]
        pl.BlockSpec((1, 2 * Lp), const_map),    # [bmu | blv]
        pl.BlockSpec((Lp, C1p), const_map),      # Wc1
        pl.BlockSpec((1, C1p), const_map),       # bc1
        pl.BlockSpec((C1p, Cp), const_map),      # Wc2
        pl.BlockSpec((1, Cp), const_map),        # bc2
    ]
    out_spec = pl.BlockSpec((TB, Cp), batch_map)

    out_p = pl.pallas_call(
        _vae_classifier_kernel,
        out_shape=jax.ShapeDtypeStruct((Bp, Cp), jnp.float32),
        grid=grid,
        in_specs=in_specs,
        out_specs=out_spec,
        compiler_params=pltpu.CompilerParams(
            dimension_semantics=("parallel",),
            vmem_limit_bytes=32 * 1024 * 1024,
        ),
    )(x_p, eps_p, w1_p, b1_p, wml_p, bml_p, wc1_p, bc1_p, wc2_p, bc2_p)

    return out_p[:B, :C]


def init_params(key, in_dim, enc_hidden, latent_dim, num_classes):
    ks = jax.random.split(key, 10)

    def lin(kw, kb, fan_in, fan_out):
        bound = 1.0 / jnp.sqrt(fan_in)
        w = jax.random.uniform(kw, (fan_in, fan_out), jnp.float32, -bound, bound)
        b = jax.random.uniform(kb, (1, fan_out), jnp.float32, -bound, bound)
        return w, b

    w1, b1 = lin(ks[0], ks[1], in_dim, enc_hidden)
    wmu, bmu = lin(ks[2], ks[3], enc_hidden, latent_dim)
    wlv, blv = lin(ks[4], ks[5], enc_hidden, latent_dim)
    wc1, bc1 = lin(ks[6], ks[7], latent_dim, 64)
    wc2, bc2 = lin(ks[8], ks[9], 64, num_classes)
    return (w1, b1, wmu, bmu, wlv, blv, wc1, bc1, wc2, bc2)


if __name__ == "__main__":
    # Small shapes consistent with the module.
    B, C, H, W = 2, 4, 16, 16          # input x: NCHW
    latent_dim = 8
    enc_hidden = 32
    num_classes = 4
    in_dim = C * H * W

    key = jax.random.PRNGKey(0)
    k_x, k_p, k_eps = jax.random.split(key, 3)

    x = jax.random.normal(k_x, (B, C, H, W), dtype=jnp.float32)
    params = init_params(k_p, in_dim, enc_hidden, latent_dim, num_classes)
    eps = jax.random.normal(k_eps, (B, latent_dim), dtype=jnp.float32)

    probs = vae_classifier_forward(x, params, eps)
    probs = jax.block_until_ready(probs)

    # Pure-JAX reference (same bf16 cast on the first matmul as the kernel).
    (w1, b1, wmu, bmu, wlv, blv, wc1, bc1, wc2, bc2) = params
    xf = x.reshape(B, -1)
    h = jnp.dot(xf.astype(jnp.bfloat16), w1.astype(jnp.bfloat16),
                preferred_element_type=jnp.float32) + b1
    h = jnp.maximum(h, 0.0)
    mu = h @ wmu + bmu
    logvar = h @ wlv + blv
    z = mu + eps * jnp.exp(0.5 * logvar)
    c1 = jnp.maximum(z @ wc1 + bc1, 0.0)
    ref = jax.nn.softmax(c1 @ wc2 + bc2, axis=1)

    assert probs.shape == (B, num_classes)
    assert jnp.allclose(probs, ref, atol=2e-3, rtol=2e-3)
    assert jnp.allclose(jnp.sum(probs, axis=1), 1.0, atol=2e-3)

    print("KERNEL_OK")
</pallas_src>

<mosaic_0001>
module attributes {stable_mosaic.version = 11 : i64} {
  func.func @_vae_classifier_kernel(%arg0: i32, %arg1: memref<8x1024xbf16, #tpu.memory_space<vmem>>, %arg2: memref<8x128xf32, #tpu.memory_space<vmem>>, %arg3: memref<1024x128xbf16, #tpu.memory_space<vmem>>, %arg4: memref<1x128xf32, #tpu.memory_space<vmem>>, %arg5: memref<128x256xf32, #tpu.memory_space<vmem>>, %arg6: memref<1x256xf32, #tpu.memory_space<vmem>>, %arg7: memref<128x128xf32, #tpu.memory_space<vmem>>, %arg8: memref<1x128xf32, #tpu.memory_space<vmem>>, %arg9: memref<128x128xf32, #tpu.memory_space<vmem>>, %arg10: memref<1x128xf32, #tpu.memory_space<vmem>>, %arg11: memref<8x128xf32, #tpu.memory_space<vmem>>) attributes {dimension_semantics = [#tpu.dimension_semantics<parallel>], iteration_bounds = array<i64: 1>, scalar_prefetch = 0 : i64, scratch_operands = 0 : i64, tpu.core_type = #tpu.core_type<tc>, window_params = [{transform_indices = @transform_0, window_bounds = array<i64: 8, 1024>}, {transform_indices = @transform_1, window_bounds = array<i64: 8, 128>}, {pipeline_mode = #tpu.pipeline_mode<synchronous>, transform_indices = @transform_2, window_bounds = array<i64: 1024, 128>}, {pipeline_mode = #tpu.pipeline_mode<synchronous>, transform_indices = @transform_3, window_bounds = array<i64: 1, 128>}, {pipeline_mode = #tpu.pipeline_mode<synchronous>, transform_indices = @transform_4, window_bounds = array<i64: 128, 256>}, {pipeline_mode = #tpu.pipeline_mode<synchronous>, transform_indices = @transform_5, window_bounds = array<i64: 1, 256>}, {pipeline_mode = #tpu.pipeline_mode<synchronous>, transform_indices = @transform_6, window_bounds = array<i64: 128, 128>}, {pipeline_mode = #tpu.pipeline_mode<synchronous>, transform_indices = @transform_7, window_bounds = array<i64: 1, 128>}, {pipeline_mode = #tpu.pipeline_mode<synchronous>, transform_indices = @transform_8, window_bounds = array<i64: 128, 128>}, {pipeline_mode = #tpu.pipeline_mode<synchronous>, transform_indices = @transform_9, window_bounds = array<i64: 1, 128>}, {transform_indices = @transform_10, window_bounds = array<i64: 8, 128>}]} {
    %c0 = arith.constant 0 : index
    %c0_0 = arith.constant 0 : index
    %0 = vector.load %arg1[%c0, %c0_0] : memref<8x1024xbf16, #tpu.memory_space<vmem>>, vector<8x1024xbf16>
    %c0_1 = arith.constant 0 : index
    %c0_2 = arith.constant 0 : index
    %1 = vector.load %arg3[%c0_1, %c0_2] : memref<1024x128xbf16, #tpu.memory_space<vmem>>, vector<1024x128xbf16>
    %cst = arith.constant dense<0.000000e+00> : vector<8x128xf32>
    %2 = tpu.matmul %0, %1, %cst {dimension_numbers = #tpu.dot_dimension_numbers<[1], [0], [0], [1], [0, 0, 1, 1], [], []>} : vector<8x1024xbf16>, vector<1024x128xbf16>, vector<8x128xf32> -> vector<8x128xf32>
    %c0_3 = arith.constant 0 : index
    %c0_4 = arith.constant 0 : index
    %3 = vector.load %arg4[%c0_3, %c0_4] : memref<1x128xf32, #tpu.memory_space<vmem>>, vector<1x128xf32>
    %4 = vector.broadcast %3 : vector<1x128xf32> to vector<8x128xf32>
    %5 = arith.addf %2, %4 : vector<8x128xf32>
    %cst_5 = arith.constant 0.000000e+00 : f32
    %6 = vector.broadcast %cst_5 : f32 to vector<8x128xf32>
    %7 = arith.maximumf %5, %6 : vector<8x128xf32>
    %c0_6 = arith.constant 0 : index
    %c0_7 = arith.constant 0 : index
    %8 = vector.load %arg5[%c0_6, %c0_7] : memref<128x256xf32, #tpu.memory_space<vmem>>, vector<128x256xf32>
    %cst_8 = arith.constant dense<0.000000e+00> : vector<8x256xf32>
    %9 = tpu.matmul %7, %8, %cst_8 {dimension_numbers = #tpu.dot_dimension_numbers<[1], [0], [0], [1], [0, 0, 1, 1], [], []>} : vector<8x128xf32>, vector<128x256xf32>, vector<8x256xf32> -> vector<8x256xf32>
    %c0_9 = arith.constant 0 : index
    %c0_10 = arith.constant 0 : index
    %10 = vector.load %arg6[%c0_9, %c0_10] : memref<1x256xf32, #tpu.memory_space<vmem>>, vector<1x256xf32>
    %11 = vector.broadcast %10 : vector<1x256xf32> to vector<8x256xf32>
    %12 = arith.addf %9, %11 : vector<8x256xf32>
    %13 = vector.extract_strided_slice %12 {offsets = [0, 0], sizes = [8, 128], strides = [1, 1]} : vector<8x256xf32> to vector<8x128xf32>
    %14 = vector.extract_strided_slice %12 {offsets = [0, 128], sizes = [8, 128], strides = [1, 1]} : vector<8x256xf32> to vector<8x128xf32>
    %c0_11 = arith.constant 0 : index
    %c0_12 = arith.constant 0 : index
    %15 = vector.load %arg2[%c0_11, %c0_12] : memref<8x128xf32, #tpu.memory_space<vmem>>, vector<8x128xf32>
    %cst_13 = arith.constant 5.000000e-01 : f32
    %16 = vector.broadcast %cst_13 : f32 to vector<8x128xf32>
    %17 = arith.mulf %16, %14 : vector<8x128xf32>
    %18 = math.exp %17 : vector<8x128xf32>
    %19 = arith.mulf %15, %18 : vector<8x128xf32>
    %20 = arith.addf %13, %19 : vector<8x128xf32>
    %c0_14 = arith.constant 0 : index
    %c0_15 = arith.constant 0 : index
    %21 = vector.load %arg7[%c0_14, %c0_15] : memref<128x128xf32, #tpu.memory_space<vmem>>, vector<128x128xf32>
    %cst_16 = arith.constant dense<0.000000e+00> : vector<8x128xf32>
    %22 = tpu.matmul %20, %21, %cst_16 {dimension_numbers = #tpu.dot_dimension_numbers<[1], [0], [0], [1], [0, 0, 1, 1], [], []>} : vector<8x128xf32>, vector<128x128xf32>, vector<8x128xf32> -> vector<8x128xf32>
    %c0_17 = arith.constant 0 : index
    %c0_18 = arith.constant 0 : index
    %23 = vector.load %arg8[%c0_17, %c0_18] : memref<1x128xf32, #tpu.memory_space<vmem>>, vector<1x128xf32>
    %24 = vector.broadcast %23 : vector<1x128xf32> to vector<8x128xf32>
    %25 = arith.addf %22, %24 : vector<8x128xf32>
    %cst_19 = arith.constant 0.000000e+00 : f32
    %26 = vector.broadcast %cst_19 : f32 to vector<8x128xf32>
    %27 = arith.maximumf %25, %26 : vector<8x128xf32>
    %c0_20 = arith.constant 0 : index
    %c0_21 = arith.constant 0 : index
    %28 = vector.load %arg9[%c0_20, %c0_21] : memref<128x128xf32, #tpu.memory_space<vmem>>, vector<128x128xf32>
    %cst_22 = arith.constant dense<0.000000e+00> : vector<8x128xf32>
    %29 = tpu.matmul %27, %28, %cst_22 {dimension_numbers = #tpu.dot_dimension_numbers<[1], [0], [0], [1], [0, 0, 1, 1], [], []>} : vector<8x128xf32>, vector<128x128xf32>, vector<8x128xf32> -> vector<8x128xf32>
    %c0_23 = arith.constant 0 : index
    %c0_24 = arith.constant 0 : index
    %30 = vector.load %arg10[%c0_23, %c0_24] : memref<1x128xf32, #tpu.memory_space<vmem>>, vector<1x128xf32>
    %31 = vector.broadcast %30 : vector<1x128xf32> to vector<8x128xf32>
    %32 = arith.addf %29, %31 : vector<8x128xf32>
    %cst_25 = arith.constant dense<0xFF800000> : vector<8xf32>
    %33 = vector.multi_reduction <maximumf>, %32, %cst_25 [1] : vector<8x128xf32> to vector<8xf32>
    %34 = vector.shape_cast %33 : vector<8xf32> to vector<8x1xf32>
    %35 = vector.broadcast %34 : vector<8x1xf32> to vector<8x128xf32>
    %36 = arith.subf %32, %35 : vector<8x128xf32>
    %37 = math.exp %36 : vector<8x128xf32>
    %cst_26 = arith.constant dense<0.000000e+00> : vector<8xf32>
    %38 = vector.multi_reduction <add>, %37, %cst_26 [1] : vector<8x128xf32> to vector<8xf32>
    %39 = vector.shape_cast %38 : vector<8xf32> to vector<8x1xf32>
    %40 = tpu.reciprocal %39 {approx = true} : vector<8x1xf32> -> vector<8x1xf32>
    %41 = vector.broadcast %40 : vector<8x1xf32> to vector<8x128xf32>
    %42 = arith.mulf %37, %41 : vector<8x128xf32>
    %c0_27 = arith.constant 0 : index
    %c0_28 = arith.constant 0 : index
    %43 = vector.load %arg11[%c0_27, %c0_28] : memref<8x128xf32, #tpu.memory_space<vmem>>, vector<8x128xf32>
    tpu.vector_store %arg11[%c0_27, %c0_28], %42 {strides = array<i32>} : memref<8x128xf32, #tpu.memory_space<vmem>>, vector<8x128xf32>,
    return
  }
  func.func @transform_0(%arg0: i32) -> (i32, i32) {
    %c0_i32 = arith.constant 0 : i32
    %c0_i32_0 = arith.constant 0 : i32
    return %arg0, %c0_i32 : i32, i32
  }
  func.func @transform_1(%arg0: i32) -> (i32, i32) {
    %c0_i32 = arith.constant 0 : i32
    %c0_i32_0 = arith.constant 0 : i32
    return %arg0, %c0_i32 : i32, i32
  }
  func.func @transform_2(%arg0: i32) -> (i32, i32) {
    %c0_i32 = arith.constant 0 : i32
    %c0_i32_0 = arith.constant 0 : i32
    %c0_i32_1 = arith.constant 0 : i32
    return %c0_i32, %c0_i32_0 : i32, i32
  }
  func.func @transform_3(%arg0: i32) -> (i32, i32) {
    %c0_i32 = arith.constant 0 : i32
    %c0_i32_0 = arith.constant 0 : i32
    %c0_i32_1 = arith.constant 0 : i32
    return %c0_i32, %c0_i32_0 : i32, i32
  }
  func.func @transform_4(%arg0: i32) -> (i32, i32) {
    %c0_i32 = arith.constant 0 : i32
    %c0_i32_0 = arith.constant 0 : i32
    %c0_i32_1 = arith.constant 0 : i32
    return %c0_i32, %c0_i32_0 : i32, i32
  }
  func.func @transform_5(%arg0: i32) -> (i32, i32) {
    %c0_i32 = arith.constant 0 : i32
    %c0_i32_0 = arith.constant 0 : i32
    %c0_i32_1 = arith.constant 0 : i32
    return %c0_i32, %c0_i32_0 : i32, i32
  }
  func.func @transform_6(%arg0: i32) -> (i32, i32) {
    %c0_i32 = arith.constant 0 : i32
    %c0_i32_0 = arith.constant 0 : i32
    %c0_i32_1 = arith.constant 0 : i32
    return %c0_i32, %c0_i32_0 : i32, i32
  }
  func.func @transform_7(%arg0: i32) -> (i32, i32) {
    %c0_i32 = arith.constant 0 : i32
    %c0_i32_0 = arith.constant 0 : i32
    %c0_i32_1 = arith.constant 0 : i32
    return %c0_i32, %c0_i32_0 : i32, i32
  }
  func.func @transform_8(%arg0: i32) -> (i32, i32) {
    %c0_i32 = arith.constant 0 : i32
    %c0_i32_0 = arith.constant 0 : i32
    %c0_i32_1 = arith.constant 0 : i32
    return %c0_i32, %c0_i32_0 : i32, i32
  }
  func.func @transform_9(%arg0: i32) -> (i32, i32) {
    %c0_i32 = arith.constant 0 : i32
    %c0_i32_0 = arith.constant 0 : i32
    %c0_i32_1 = arith.constant 0 : i32
    return %c0_i32, %c0_i32_0 : i32, i32
  }
  func.func @transform_10(%arg0: i32) -> (i32, i32) {
    %c0_i32 = arith.constant 0 : i32
    %c0_i32_0 = arith.constant 0 : i32
    return %arg0, %c0_i32 : i32, i32
  }
}

</mosaic_0001>

<bundles_post_ra>
// kernel: tpu_custom_call.1
= control target key start
LH: loop header
LB: loop body
LE: loop exit
PB: predicated region body
PF: predicated region fallthrough
CT: control target
= control target key end

     0   :  { %15 = vsyncpa [#allocation3], 0  ;;  %s1968_s0 = inlined_call_operand.hbm [shape: bf16[8,1024], index: 0, kind: input, shape index: {}]   ;;  %s1969_s1 = inlined_call_operand.hbm [shape: f32[8,128], index: 1, kind: input, shape index: {}]   ;;  %s1970_s2 = inlined_call_operand.hbm [shape: bf16[1024,128], index: 2, kind: input, shape index: {}]   ;;  %s1971_s3 = inlined_call_operand.vmem [shape: f32[1,128], index: 3, kind: input, shape index: {}]   ;;  %s1972_s4 = inlined_call_operand.hbm [shape: f32[128,256], index: 4, kind: input, shape index: {}]   ;;  %s1973_s5 = inlined_call_operand.vmem [shape: f32[1,256], index: 5, kind: input, shape index: {}]   ;;  %s1974_s6 = inlined_call_operand.hbm [shape: f32[128,128], index: 6, kind: input, shape index: {}]   ;;  %s1975_s7 = inlined_call_operand.vmem [shape: f32[1,128], index: 7, kind: input, shape index: {}]   ;;  %s1976_s8 = inlined_call_operand.hbm [shape: f32[128,128], index: 8, kind: input, shape index: {}]   ;;  %s1977_s9 = inlined_call_operand.vmem [shape: f32[1,128], index: 9, kind: input, shape index: {}]   ;;  %s1978_s10 = inlined_call_operand.hbm [shape: f32[8,128], index: 10, kind: output, shape index: {}]  }
   0x1   :  { %16 = vsyncpa [#allocation6], 0 }
   0x2   :  { %17 = vsyncpa [#allocation9], 0 }
   0x3   :  { %18 = vsyncpa [#allocation12], 0 }
   0x4   :  { %19 = vsyncpa [#allocation4], 0  ;;  %s1768_s13 = smov [#allocation5]   ;;  %s1769_s15 = smov [#allocation8]  }
   0x5   :  { %s36_s14 = sshll.u32 %s1768_s13, 4  ;;  %s59_s16 = sshll.u32 %s1769_s15, 4  ;;  %s37_s14 = int_to_ptr.vmem [resolvable:$true] %s36_s14  ;;  %s1839_s16 = int_to_ptr.vmem [resolvable:$true] %s59_s16 }
   0x6   :  { %s1604_s19 = scalar_lea.hbm %s1969_s1, 128 }
   0x7   :  { %p1605_p0 = scmp.ne.s32.totalorder %s1969_s1, %s1604_s19  ;;  %p1608_p1 = scmp.lt.u32.totalorder %s1604_s19, %s1969_s1 }
   0x9   :  { %p1610_p2 = pnand %p1608_p1, %p1605_p0 }
   0xb   :  { %1613 = shalt.err (!%p1610_p2)
}
   0xc   :  { %s1614_s24 = scalar_lea.vmem %s37_s14, 128  ;;  %p1619_p4 = scmp.lt.s32.totalorder %s37_s14, %s37_s14 }
   0xd   :  { %p1615_p3 = scmp.ne.s32.totalorder %s37_s14, %s1614_s24  ;;  %p1620_p5 = scmp.lt.s32.totalorder %s1614_s24, %s1614_s24 }
   0xf   :  { %p1621_p6 = por %p1620_p5, %p1619_p4 }
  0x11   :  { %p1622_p7 = pnand %p1621_p6, %p1615_p3 }
  0x13   :  { %1625 = shalt.err (!%p1622_p7)
}
  0x14   :  { %39 = dma.hbm_to_vmem [thread:$0]  %s1969_s1, 128, %s37_s14, [#allocation6]  }
  0x15   :  { %s1626_s29 = scalar_lea.hbm %s1972_s4, 4096 }
  0x16   :  { %p1627_p8 = scmp.ne.s32.totalorder %s1972_s4, %s1626_s29  ;;  %p1630_p9 = scmp.lt.u32.totalorder %s1626_s29, %s1972_s4 }
  0x18   :  { %p1632_p10 = pnand %p1630_p9, %p1627_p8 }
  0x1a   :  { %1635 = shalt.err (!%p1632_p10)
}
  0x1b   :  { %s1636_s15 = scalar_lea.vmem %s1839_s16, 4096  ;;  %p1641_p12 = scmp.lt.s32.totalorder %s1839_s16, %s1839_s16 }
  0x1c   :  { %p1637_p11 = scmp.ne.s32.totalorder %s1839_s16, %s1636_s15  ;;  %p1642_p13 = scmp.lt.s32.totalorder %s1636_s15, %s1636_s15 }
  0x1e   :  { %p1643_p0 = por %p1642_p13, %p1641_p12 }
  0x20   :  { %p1644_p1 = pnand %p1643_p0, %p1637_p11 }
  0x22   :  { %1647 = shalt.err (!%p1644_p1)
}
  0x23   :  { %s1770_s1 = smov 256   ;;  %s1771_s14 = smov 16  }
  0x24   :  { %65 = dma.hbm_to_vmem [thread:$0]  %s1972_s4, 4096, %s1839_s16, [#allocation9], %s1770_s1, %s1770_s1, %s1771_s14  }
  0x25   :  { %s1772_s19 = smov [#allocation2]   ;;  %s1773_s21 = smov [#allocation7]  }
  0x26   :  { %s26_s20 = sshll.u32 %s1772_s19, 4  ;;  %s45_s22 = sshll.u32 %s1773_s21, 4  ;;  %s27_s20 = int_to_ptr.vmem [resolvable:$true] %s26_s20  ;;  %s1870_s22 = int_to_ptr.vmem [resolvable:$true] %s45_s22 }
  0x27   :  { %s1648_s25 = scalar_lea.hbm %s1968_s0, 512 }
  0x28   :  { %p1649_p2 = scmp.ne.s32.totalorder %s1968_s0, %s1648_s25  ;;  %p1652_p3 = scmp.lt.u32.totalorder %s1648_s25, %s1968_s0 }
  0x2a   :  { %p1654_p4 = pnand %p1652_p3, %p1649_p2 }
  0x2c   :  { %1657 = shalt.err (!%p1654_p4)
}
  0x2d   :  { %s1658_s4 = scalar_lea.vmem %s27_s20, 512  ;;  %p1663_p6 = scmp.lt.s32.totalorder %s27_s20, %s27_s20 }
  0x2e   :  { %p1659_p5 = scmp.ne.s32.totalorder %s27_s20, %s1658_s4  ;;  %p1664_p7 = scmp.lt.s32.totalorder %s1658_s4, %s1658_s4 }
  0x30   :  { %p1665_p8 = por %p1664_p7, %p1663_p6 }
  0x32   :  { %p1666_p9 = pnand %p1665_p8, %p1659_p5 }
  0x34   :  { %1669 = shalt.err (!%p1666_p9)
}
  0x35   :  { %29 = dma.hbm_to_vmem [thread:$0]  %s1968_s0, 512, %s27_s20, [#allocation3]  }
  0x36   :  { %s1670_s13 = scalar_lea.hbm %s1970_s2, 8192 }
  0x37   :  { %p1671_p10 = scmp.ne.s32.totalorder %s1970_s2, %s1670_s13  ;;  %p1674_p11 = scmp.lt.u32.totalorder %s1670_s13, %s1970_s2 }
  0x39   :  { %p1676_p12 = pnand %p1674_p11, %p1671_p10 }
  0x3b   :  { %1679 = shalt.err (!%p1676_p12)
}
  0x3c   :  { %s1680_s18 = scalar_lea.vmem %s1870_s22, 8192  ;;  %p1685_p0 = scmp.lt.s32.totalorder %s1870_s22, %s1870_s22 }
  0x3d   :  { %p1681_p13 = scmp.ne.s32.totalorder %s1870_s22, %s1680_s18  ;;  %p1686_p1 = scmp.lt.s32.totalorder %s1680_s18, %s1680_s18 }
  0x3f   :  { %p1687_p2 = por %p1686_p1, %p1685_p0 }
  0x41   :  { %p1688_p3 = pnand %p1687_p2, %p1681_p13 }
  0x43   :  { %1691 = shalt.err (!%p1688_p3)
}
  0x44   :  { %s1774_s0 = smov 64   ;;  %s1775_s19 = smov 4  }
  0x45   :  { %51 = dma.hbm_to_vmem [thread:$0]  %s1970_s2, 8192, %s1870_s22, [#allocation6], %s1774_s0, %s1774_s0, %s1775_s19  }
  0x46   :  { %s1776_s23 = smov [#allocation10]   ;;  %s1692_s27 = scalar_lea.hbm %s1974_s6, 2048 }
  0x47   :  { %s73_s24 = sshll.u32 %s1776_s23, 4  ;;  %p1693_p4 = scmp.ne.s32.totalorder %s1974_s6, %s1692_s27  ;;  %s74_s24 = int_to_ptr.vmem [resolvable:$true] %s73_s24 }
  0x48   :  { %p1696_p5 = scmp.lt.u32.totalorder %s1692_s27, %s1974_s6 }
  0x4a   :  { %p1698_p6 = pnand %p1696_p5, %p1693_p4 }
  0x4c   :  { %1701 = shalt.err (!%p1698_p6)
}
  0x4d   :  { %s1702_s30 = scalar_lea.vmem %s74_s24, 2048  ;;  %p1707_p8 = scmp.lt.s32.totalorder %s74_s24, %s74_s24 }
  0x4e   :  { %p1703_p7 = scmp.ne.s32.totalorder %s74_s24, %s1702_s30  ;;  %p1708_p9 = scmp.lt.s32.totalorder %s1702_s30, %s1702_s30 }
  0x50   :  { %p1709_p10 = por %p1708_p9, %p1707_p8 }
  0x52   :  { %p1710_p11 = pnand %p1709_p10, %p1703_p7 }
  0x54   :  { %1713 = shalt.err (!%p1710_p11)
}
  0x55   :  { %s1777_s2 = smov 128   ;;  %s1778_s22 = smov 8  }
  0x56   :  { %79 = dma.hbm_to_vmem [thread:$0]  %s1974_s6, 2048, %s74_s24, [#allocation9], %s1777_s2, %s1777_s2, %s1778_s22  }
  0x57   :  { %s1779_s13 = smov [#allocation11]   ;;  %s1714_s17 = scalar_lea.hbm %s1976_s8, 2048 }
  0x58   :  { %s87_s15 = sshll.u32 %s1779_s13, 4  ;;  %p1715_p12 = scmp.ne.s32.totalorder %s1976_s8, %s1714_s17  ;;  %s88_s15 = int_to_ptr.vmem [resolvable:$true] %s87_s15 }
  0x59   :  { %p1718_p13 = scmp.lt.u32.totalorder %s1714_s17, %s1976_s8 }
  0x5b   :  { %p1720_p0 = pnand %p1718_p13, %p1715_p12 }
  0x5d   :  { %1723 = shalt.err (!%p1720_p0)
}
  0x5e   :  { %s1724_s21 = scalar_lea.vmem %s88_s15, 2048  ;;  %p1729_p2 = scmp.lt.s32.totalorder %s88_s15, %s88_s15 }
  0x5f   :  { %p1725_p1 = scmp.ne.s32.totalorder %s88_s15, %s1724_s21  ;;  %p1730_p3 = scmp.lt.s32.totalorder %s1724_s21, %s1724_s21 }
  0x61   :  { %p1731_p4 = por %p1730_p3, %p1729_p2 }
  0x63   :  { %p1732_p5 = pnand %p1731_p4, %p1725_p1 }
  0x65   :  { %1735 = shalt.err (!%p1732_p5)
}
  0x66   :  { %93 = dma.hbm_to_vmem [thread:$0]  %s1976_s8, 2048, %s88_s15, [#allocation12], %s1777_s2, %s1777_s2, %s1778_s22  }
  0x67   :  { %1758 = dma.done.wait [#allocation3], 512  }
  0x68   :  { %1759 = vsyncadd [#allocation3], 4294966784 }
  0x69   :  { %1760 = dma.done.wait [#allocation6], 8320  }
  0x6a   :  { %1761 = vsyncadd [#allocation6], 4294958976 }
  0x6b   :  { %1762 = dma.done.wait [#allocation9], 6144  }
  0x6c   :  { %1763 = vsyncadd [#allocation9], 4294961152 }
  0x6d   :  { %1764 = dma.done.wait [#allocation12], 2048  }
  0x6e   :  { %1765 = vsyncadd [#allocation12], 4294965248  ;;  %v1526_v0 = vld [vmem:[#allocation7 + $0x40] sm:$0xff]   ;;  %v1530_v4 = vld [vmem:[#allocation7 + $0x48] sm:$0xff]   ;;  %vm1782_vm0 = vmmov 0  }
  0x6f   :  { %v1527_v1 = vld [vmem:[#allocation7 + $0xc0] sm:$0xff]   ;;  %1238 = vmatprep.subr.bf16.mxu0 %v1526_v0  ;;  %v1531_v5 = vld [vmem:[#allocation7 + $0xc8] sm:$0xff]   ;;  %v1534_v8 = vld [vmem:[#allocation7 + $0x50] sm:$0xff]  }
  0x70   :  { %v1528_v2 = vld [vmem:[#allocation7] sm:$0xff]   ;;  %1260 = vmatprep.subr.bf16.mxu1 %v1527_v1  ;;  %v1532_v6 = vld [vmem:[#allocation7 + $0x8] sm:$0xff]   ;;  %v1535_v9 = vld [vmem:[#allocation7 + $0xd0] sm:$0xff]  }
  0x71   :  { %v1529_v3 = vld [vmem:[#allocation7 + $0x80] sm:$0xff]   ;;  %1239 = vmatpush3.bf16.msra.mxu0 %v1528_v2  ;;  %v1533_v7 = vld [vmem:[#allocation7 + $0x88] sm:$0xff]   ;;  %v1536_v10 = vld [vmem:[#allocation7 + $0x10] sm:$0xff]  }
  0x72   :  { %1261 = vmatpush3.bf16.msra.mxu1 %v1529_v3  ;;  %1240 = vmatprep.subr.bf16.mxu0 %v1530_v4  ;;  %v1537_v11 = vld [vmem:[#allocation7 + $0x90] sm:$0xff]   ;;  %v1538_v12 = vld [vmem:[#allocation7 + $0x58] sm:$0xff]   ;;  %v1542_v16 = vld [vmem:[#allocation7 + $0x60] sm:$0xff]  }
  0x73   :  { %1262 = vmatprep.subr.bf16.mxu1 %v1531_v5  ;;  %v1539_v13 = vld [vmem:[#allocation7 + $0xd8] sm:$0xff]   ;;  %v1543_v17 = vld [vmem:[#allocation7 + $0xe0] sm:$0xff]   ;;  %v1546_v20 = vld [vmem:[#allocation7 + $0x68] sm:$0xff]  }
  0x74   :  { %v1540_v14 = vld [vmem:[#allocation7 + $0x18] sm:$0xff]   ;;  %v1544_v18 = vld [vmem:[#allocation7 + $0x20] sm:$0xff]   ;;  %v1547_v21 = vld [vmem:[#allocation7 + $0xe8] sm:$0xff]  }
  0x75   :  { %1241 = vmatpush3.bf16.msra.mxu0 %v1532_v6  ;;  %v1541_v15 = vld [vmem:[#allocation7 + $0x98] sm:$0xff]   ;;  %v1545_v19 = vld [vmem:[#allocation7 + $0xa0] sm:$0xff]   ;;  %v1548_v22 = vld [vmem:[#allocation7 + $0x28] sm:$0xff]  }
  0x76   :  { %1263 = vmatpush3.bf16.msra.mxu1 %v1533_v7  ;;  %1242 = vmatprep.subr.bf16.mxu0 %v1534_v8  ;;  %v1549_v23 = vld [vmem:[#allocation7 + $0xa8] sm:$0xff]   ;;  %v1550_v24 = vld [vmem:[#allocation7 + $0x70] sm:$0xff]   ;;  %v1554_v28 = vld [vmem:[#allocation7 + $0x78] sm:$0xff]  }
  0x77   :  { %1264 = vmatprep.subr.bf16.mxu1 %v1535_v9  ;;  %v1551_v25 = vld [vmem:[#allocation7 + $0xf0] sm:$0xff]   ;;  %v1555_v29 = vld [vmem:[#allocation7 + $0xf8] sm:$0xff]   ;;  %v116_v33 = vld [vmem:[#allocation2 + $0x8] sm:$0xff] }
  0x78   :  { %v1552_v26 = vld [vmem:[#allocation7 + $0x30] sm:$0xff]   ;;  %v1556_v30 = vld [vmem:[#allocation7 + $0x38] sm:$0xff]   ;;  %v1166_v36 = vcombine.low %v116_v33, %v116_v33  ;;  %v1167_v37 = vcombine.high %v116_v33, %v116_v33  ;;  %v1562_v38 = vld [vmem:[#allocation7 + $0x140] sm:$0xff]  }
  0x79   :  { %1243 = vmatpush3.bf16.msra.mxu0 %v1536_v10  ;;  %v1553_v27 = vld [vmem:[#allocation7 + $0xb0] sm:$0xff]   ;;  %v1557_v31 = vld [vmem:[#allocation7 + $0xb8] sm:$0xff]   ;;  %v1563_v39 = vld [vmem:[#allocation7 + $0x1c0] sm:$0xff]  }
  0x7a   :  { %1265 = vmatpush3.bf16.msra.mxu1 %v1537_v11  ;;  %1244 = vmatprep.subr.bf16.mxu0 %v1538_v12  ;;  %v115_v32 = vld [vmem:[#allocation2] sm:$0xff]  ;;  %v1564_v40 = vld [vmem:[#allocation7 + $0x100] sm:$0xff]   ;;  %v1566_v42 = vld [vmem:[#allocation7 + $0x148] sm:$0xff]  }
  0x7b   :  { %1266 = vmatprep.subr.bf16.mxu1 %v1539_v13  ;;  %v1164_v34 = vcombine.low %v115_v32, %v115_v32  ;;  %v1165_v35 = vcombine.high %v115_v32, %v115_v32  ;;  %738 = vmatprep.mubr.bf16.mxu1 %v1167_v37  ;;  %v1565_v41 = vld [vmem:[#allocation7 + $0x180] sm:$0xff]   ;;  %v1567_v43 = vld [vmem:[#allocation7 + $0x1c8] sm:$0xff]   ;;  %v1570_v46 = vld [vmem:[#allocation7 + $0x150] sm:$0xff]  }
  0x7c   :  { %v1568_v44 = vld [vmem:[#allocation7 + $0x108] sm:$0xff]   ;;  %v1571_v47 = vld [vmem:[#allocation7 + $0x1d0] sm:$0xff]   ;;  %v1574_v50 = vld [vmem:[#allocation7 + $0x158] sm:$0xff]  }
  0x7d   :  { %1245 = vmatpush3.bf16.msra.mxu0 %v1540_v14  ;;  %698 = vmatprep.mubr.bf16.mxu0 %v1165_v35  ;;  %v1569_v45 = vld [vmem:[#allocation7 + $0x188] sm:$0xff]   ;;  %v1572_v48 = vld [vmem:[#allocation7 + $0x110] sm:$0xff]   ;;  %v1575_v51 = vld [vmem:[#allocation7 + $0x1d8] sm:$0xff]  }
  0x7e   :  { %1267 = vmatpush3.bf16.msra.mxu1 %v1541_v15  ;;  %1246 = vmatprep.subr.bf16.mxu0 %v1542_v16  ;;  %v1573_v49 = vld [vmem:[#allocation7 + $0x190] sm:$0xff]   ;;  %v1576_v52 = vld [vmem:[#allocation7 + $0x118] sm:$0xff]   ;;  %v1578_v54 = vld [vmem:[#allocation7 + $0x160] sm:$0xff]  }
  0x7f   :  { %1268 = vmatprep.subr.bf16.mxu1 %v1543_v17  ;;  %v1577_v53 = vld [vmem:[#allocation7 + $0x198] sm:$0xff]   ;;  %v1579_v55 = vld [vmem:[#allocation7 + $0x1e0] sm:$0xff]   ;;  %v1582_v58 = vld [vmem:[#allocation7 + $0x168] sm:$0xff]  }
  0x80   :  { %v1580_v56 = vld [vmem:[#allocation7 + $0x120] sm:$0xff]   ;;  %v1583_v59 = vld [vmem:[#allocation7 + $0x1e8] sm:$0xff]   ;;  %v1586_v62 = vld [vmem:[#allocation7 + $0x170] sm:$0xff]  }
  0x81   :  { %1247 = vmatpush3.bf16.msra.mxu0 %v1544_v18  ;;  %v1581_v57 = vld [vmem:[#allocation7 + $0x1a0] sm:$0xff]   ;;  %v1584_v60 = vld [vmem:[#allocation7 + $0x128] sm:$0xff]   ;;  %v1587_v63 = vld [vmem:[#allocation7 + $0x1f0] sm:$0xff]  }
  0x82   :  { %1269 = vmatpush3.bf16.msra.mxu1 %v1545_v19  ;;  %1248 = vmatprep.subr.bf16.mxu0 %v1546_v20  ;;  %v1585_v61 = vld [vmem:[#allocation7 + $0x1a8] sm:$0xff]   ;;  %v1588_v0 = vld [vmem:[#allocation7 + $0x130] sm:$0xff]   ;;  %v1590_v2 = vld [vmem:[#allocation7 + $0x178] sm:$0xff]  }
  0x83   :  { %1270 = vmatprep.subr.bf16.mxu1 %v1547_v21  ;;  %v1589_v1 = vld [vmem:[#allocation7 + $0x1b0] sm:$0xff]   ;;  %v1591_v3 = vld [vmem:[#allocation7 + $0x1f8] sm:$0xff]   ;;  %v117_v6 = vld [vmem:[#allocation2 + $0x10] sm:$0xff] }
  0x84   :  { %v1592_v4 = vld [vmem:[#allocation7 + $0x138] sm:$0xff]   ;;  %v1168_v7 = vcombine.low %v117_v6, %v117_v6  ;;  %v1169_v8 = vcombine.high %v117_v6, %v117_v6  ;;  %v118_v9 = vld [vmem:[#allocation2 + $0x18] sm:$0xff]  ;;  %v828_v12 = vld [vmem:[#allocation8 + $0x8] sm:$0xff] }
  0x85   :  { %1249 = vmatpush3.bf16.msra.mxu0 %v1548_v22  ;;  %v1593_v5 = vld [vmem:[#allocation7 + $0x1b8] sm:$0xff]   ;;  %v1170_v10 = vcombine.low %v118_v9, %v118_v9  ;;  %v1171_v11 = vcombine.high %v118_v9, %v118_v9  ;;  %v827_v14 = vld [vmem:[#allocation8] sm:$0xff]  ;;  %v829_v16 = vld [vmem:[#allocation8 + $0x10] sm:$0xff] }
  0x86   :  { %1271 = vmatpush3.bf16.msra.mxu1 %v1549_v23  ;;  %1250 = vmatprep.subr.bf16.mxu0 %v1550_v24  ;;  %v830_v13 = vld [vmem:[#allocation8 + $0x18] sm:$0xff]  ;;  %v832_v17 = vld [vmem:[#allocation8 + $0x28] sm:$0xff]  ;;  %v1432_v19 = vpack.c.bf16 %v829_v16, %v827_v14  ;;  %v831_v21 = vld [vmem:[#allocation8 + $0x20] sm:$0xff] }
  0x87   :  { %1272 = vmatprep.subr.bf16.mxu1 %v1551_v25  ;;  %v1430_v15 = vpack.c.bf16 %v830_v13, %v828_v12  ;;  %v834_v18 = vld [vmem:[#allocation8 + $0x38] sm:$0xff]  ;;  %v833_v22 = vld [vmem:[#allocation8 + $0x30] sm:$0xff]  ;;  %v836_v23 = vld [vmem:[#allocation8 + $0x48] sm:$0xff] }
  0x88   :  { %v1434_v20 = vpack.c.bf16 %v834_v18, %v832_v17  ;;  %v838_v24 = vld [vmem:[#allocation8 + $0x58] sm:$0xff]  ;;  %v1436_v25 = vpack.c.bf16 %v833_v22, %v831_v21  ;;  %v839_v33 = vld [vmem:[#allocation8 + $0x60] sm:$0xff]  ;;  %v844_v35 = vld [vmem:[#allocation8 + $0x88] sm:$0xff] }
  0x89   :  { %1251 = vmatpush3.bf16.msra.mxu0 %v1552_v26  ;;  %v1438_v26 = vpack.c.bf16 %v838_v24, %v836_v23  ;;  %v1163_v6 = vld [vmem:[%s1971_s3] ss:$0 sm:$0xff] }
  0x8a   :  { %1273 = vmatpush3.bf16.msra.mxu1 %v1553_v27  ;;  %1252 = vmatprep.subr.bf16.mxu0 %v1554_v28  ;;  %v835_v27 = vld [vmem:[#allocation8 + $0x40] sm:$0xff]  ;;  %v837_v28 = vld [vmem:[#allocation8 + $0x50] sm:$0xff] }
  0x8b   :  { %1274 = vmatprep.subr.bf16.mxu1 %v1555_v29  ;;  %v840_v29 = vld [vmem:[#allocation8 + $0x68] sm:$0xff] }
  0x8d   :  { %1253 = vmatpush3.bf16.msra.mxu0 %v1556_v30  ;;  %v842_v30 = vld [vmem:[#allocation8 + $0x78] sm:$0xff] }
  0x8e   :  { %1275 = vmatpush3.bf16.msra.mxu1 %v1557_v31  ;;  %1282 = vmatprep.subr.bf16.mxu0 %v1562_v38  ;;  %v1440_v31 = vpack.c.bf16 %v837_v28, %v835_v27  ;;  %v1442_v32 = vpack.c.bf16 %v842_v30, %v840_v29  ;;  %v952_v30 = vld [vmem:[#allocation10 + $0x20] sm:$0xff] }
  0x8f   :  { %1304 = vmatprep.subr.bf16.mxu1 %v1563_v39  ;;  %v843_v39 = vld [vmem:[#allocation8 + $0x80] sm:$0xff] }
  0x90   :  { %699 = vmatmul.mubr.bf16.vlgmr.msra.gmra.mrb[0].mxu0 %v1164_v34  ;;  %v841_v34 = vld [vmem:[#allocation8 + $0x70] sm:$0xff] }
  0x91   :  { %739 = vmatmul.mubr.bf16.vlgmr.msra.gmra.mrb[0].mxu1 %v1166_v36  ;;  %1283 = vmatpush3.bf16.msra.mxu0 %v1564_v40  ;;  %v846_v36 = vld [vmem:[#allocation8 + $0x98] sm:$0xff]  ;;  %v1444_v37 = vpack.c.bf16 %v841_v34, %v839_v33  ;;  %v845_v40 = vld [vmem:[#allocation8 + $0x90] sm:$0xff] }
  0x92   :  { %1305 = vmatpush3.bf16.msra.mxu1 %v1565_v41  ;;  %1284 = vmatprep.subr.bf16.mxu0 %v1566_v42  ;;  %v1446_v38 = vpack.c.bf16 %v846_v36, %v844_v35  ;;  %v848_v41 = vld [vmem:[#allocation8 + $0xa8] sm:$0xff]  ;;  %v850_v42 = vld [vmem:[#allocation8 + $0xb8] sm:$0xff]  ;;  %v954_v33 = vld [vmem:[#allocation10 + $0x30] sm:$0xff] }
  0x93   :  { %1306 = vmatprep.subr.bf16.mxu1 %v1567_v43  ;;  %778 = vmatprep.mubr.bf16.mxu0 %v1169_v8  ;;  %v1448_v43 = vpack.c.bf16 %v845_v40, %v843_v39  ;;  %v955_v34 = vld [vmem:[#allocation10 + $0x38] sm:$0xff]  ;;  %v956_v36 = vld [vmem:[#allocation10 + $0x40] sm:$0xff]  ;;  %v958_v39 = vld [vmem:[#allocation10 + $0x50] sm:$0xff] }
  0x94   :  { %818 = vmatprep.mubr.bf16.mxu1 %v1171_v11  ;;  %v1472_v35 = vpack.c.bf16 %v955_v34, %v954_v33  ;;  %v959_v40 = vld [vmem:[#allocation10 + $0x58] sm:$0xff] }
  0x95   :  { %1285 = vmatpush3.bf16.msra.mxu0 %v1568_v44  ;;  %v1450_v44 = vpack.c.bf16 %v850_v42, %v848_v41  ;;  %v1478_v41 = vpack.c.bf16 %v959_v40, %v958_v39  ;;  %v960_v42 = vld [vmem:[#allocation10 + $0x60] sm:$0xff] }
  0x96   :  { %1307 = vmatpush3.bf16.msra.mxu1 %v1569_v45  ;;  %1286 = vmatprep.subr.bf16.mxu0 %v1570_v46  ;;  %v847_v45 = vld [vmem:[#allocation8 + $0xa0] sm:$0xff]  ;;  %v849_v46 = vld [vmem:[#allocation8 + $0xb0] sm:$0xff] }
  0x97   :  { %1308 = vmatprep.subr.bf16.mxu1 %v1571_v47  ;;  %v1452_v47 = vpack.c.bf16 %v849_v46, %v847_v45  ;;  %v962_v45 = vld [vmem:[#allocation10 + $0x70] sm:$0xff]  ;;  %v963_v46 = vld [vmem:[#allocation10 + $0x78] sm:$0xff] }
  0x99   :  { %1287 = vmatpush3.bf16.msra.mxu0 %v1572_v48  ;;  %v852_v48 = vld [vmem:[#allocation8 + $0xc8] sm:$0xff] }
  0x9a   :  { %1309 = vmatpush3.bf16.msra.mxu1 %v1573_v49  ;;  %1288 = vmatprep.subr.bf16.mxu0 %v1574_v50  ;;  %v854_v49 = vld [vmem:[#allocation8 + $0xd8] sm:$0xff] }
  0x9b   :  { %1310 = vmatprep.subr.bf16.mxu1 %v1575_v51  ;;  %v1454_v50 = vpack.c.bf16 %v854_v49, %v852_v48  ;;  %v851_v51 = vld [vmem:[#allocation8 + $0xc0] sm:$0xff]  ;;  %v1043_v49 = vld [vmem:[#allocation11 + $0x8] sm:$0xff] }
  0x9c   :  { %v1042_v48 = vld [vmem:[#allocation11] sm:$0xff] }
  0x9d   :  { %1289 = vmatpush3.bf16.msra.mxu0 %v1576_v52  ;;  %v853_v52 = vld [vmem:[#allocation8 + $0xd0] sm:$0xff] }
  0x9e   :  { %1311 = vmatpush3.bf16.msra.mxu1 %v1577_v53  ;;  %1290 = vmatprep.subr.bf16.mxu0 %v1578_v54  ;;  %v1456_v53 = vpack.c.bf16 %v853_v52, %v851_v51  ;;  %v856_v54 = vld [vmem:[#allocation8 + $0xe8] sm:$0xff]  ;;  %v1487_v51 = vpack.c.bf16 %v1043_v49, %v1042_v48  ;;  %v1045_v52 = vld [vmem:[#allocation11 + $0x18] sm:$0xff] }
  0x9f   :  { %1312 = vmatprep.subr.bf16.mxu1 %v1579_v55  ;;  %v858_v55 = vld [vmem:[#allocation8 + $0xf8] sm:$0xff] }
  0xa1   :  { %1291 = vmatpush3.bf16.msra.mxu0 %v1580_v56  ;;  %v1458_v56 = vpack.c.bf16 %v858_v55, %v856_v54  ;;  %v1046_v54 = vld [vmem:[#allocation11 + $0x20] sm:$0xff]  ;;  %v1047_v55 = vld [vmem:[#allocation11 + $0x28] sm:$0xff] }
  0xa2   :  { %1313 = vmatpush3.bf16.msra.mxu1 %v1581_v57  ;;  %1292 = vmatprep.subr.bf16.mxu0 %v1582_v58  ;;  %v855_v57 = vld [vmem:[#allocation8 + $0xe0] sm:$0xff]  ;;  %v857_v58 = vld [vmem:[#allocation8 + $0xf0] sm:$0xff] }
  0xa3   :  { %1314 = vmatprep.subr.bf16.mxu1 %v1583_v59  ;;  %v1460_v59 = vpack.c.bf16 %v857_v58, %v855_v57  ;;  %v1048_v57 = vld [vmem:[#allocation11 + $0x30] sm:$0xff]  ;;  %v1049_v58 = vld [vmem:[#allocation11 + $0x38] sm:$0xff] }
  0xa5   :  { %1293 = vmatpush3.bf16.msra.mxu0 %v1584_v60  ;;  %v1780_v60 = vmov 0.0  }
  0xa6   :  { %1315 = vmatpush3.bf16.msra.mxu1 %v1585_v61  ;;  %1294 = vmatprep.subr.bf16.mxu0 %v1586_v62  ;;  %v948_v61 = vld [vmem:[#allocation10] sm:$0xff]  ;;  %v949_v62 = vld [vmem:[#allocation10 + $0x8] sm:$0xff] }
  0xa7   :  { %1316 = vmatprep.subr.bf16.mxu1 %v1587_v63  ;;  %v950_v63 = vld [vmem:[#allocation10 + $0x10] sm:$0xff] }
  0xa9   :  { %1295 = vmatpush3.bf16.msra.mxu0 %v1588_v0  ;;  %v1781_v0 = vmov 0.0|0.0  }
  0xaa   :  { %1317 = vmatpush3.bf16.msra.mxu1 %v1589_v1  ;;  %1296 = vmatprep.subr.bf16.mxu0 %v1590_v2  ;;  %v1463_v1 = vpack.c.bf16 %v949_v62, %v948_v61  ;;  %v951_v2 = vld [vmem:[#allocation10 + $0x18] sm:$0xff]  ;;  %v1051_v61 = vld [vmem:[#allocation11 + $0x48] sm:$0xff] }
  0xab   :  { %1318 = vmatprep.subr.bf16.mxu1 %v1591_v3  ;;  %v1466_v3 = vpack.c.bf16 %v951_v2, %v950_v63  ;;  %v1052_v63 = vld [vmem:[#allocation11 + $0x50] sm:$0xff] }
  0xad   :  { %1297 = vmatpush3.bf16.msra.mxu0 %v1592_v4 }
  0xae   :  { %1319 = vmatpush3.bf16.msra.mxu1 %v1593_v5  ;;  %1431 = vmatprep.subr.bf16.mxu0 %v1430_v15 }
  0xaf   :  { %1462 = vmatprep.subr.bf16.mxu1 %v1781_v0 }
  0xb0   :  { %779 = vmatmul.mubr.bf16.vlgmr.msra.gmra.mrb[4].mxu0 %v1168_v7 }
  0xb1   :  { %819 = vmatmul.mubr.bf16.vlgmr.msra.gmra.mrb[4].mxu1 %v1170_v10  ;;  %1433 = vmatpush1.bf16.msra.mxu0 %v1432_v19 }
  0xb2   :  { %1435 = vmatprep.subr.bf16.mxu0 %v1434_v20  ;;  %935 = vmatprep.mubr.f32.mxu0 %v1780_v60 }
  0xb3   :  { %1464 = vmatpush3.bf16.msra.mxu1 %v1463_v1  ;;  %1392 = vmatprep.mubr.msk.f32.mxu1 %vm1782_vm0, %v1780_v60  ;;  %v1053_v1 = vld [vmem:[#allocation11 + $0x58] sm:$0xff] }
  0xb4   :  { %1465 = vmatprep.subr.bf16.mxu1 %v1781_v0  ;;  %v1502_v2 = vpack.c.bf16 %v1053_v1, %v1052_v63 }
  0xb5   :  { %1437 = vmatpush1.bf16.msra.mxu0 %v1436_v25 }
  0xb6   :  { %1439 = vmatprep.subr.bf16.mxu0 %v1438_v26 }
  0xb7   :  { %1467 = vmatpush3.bf16.msra.mxu1 %v1466_v3  ;;  %v1054_v3 = vld [vmem:[#allocation11 + $0x60] sm:$0xff] }
  0xb8   :  { %1468 = vmatprep.subr.bf16.mxu1 %v1781_v0 }
  0xb9   :  { %1441 = vmatpush1.bf16.msra.mxu0 %v1440_v31  ;;  %v953_v31 = vld [vmem:[#allocation10 + $0x28] sm:$0xff] }
  0xba   :  { %1443 = vmatprep.subr.bf16.mxu0 %v1442_v32  ;;  %v1469_v32 = vpack.c.bf16 %v953_v31, %v952_v30  ;;  %v1237_v30 = vld [vmem:[%s1977_s9] ss:$0 sm:$0xff] }
  0xbc   :  { %1470 = vmatpush3.bf16.msra.mxu1 %v1469_v32 }
  0xbd   :  { %1445 = vmatpush1.bf16.msra.mxu0 %v1444_v37  ;;  %1471 = vmatprep.subr.bf16.mxu1 %v1781_v0  ;;  %v957_v37 = vld [vmem:[#allocation10 + $0x48] sm:$0xff] }
  0xbe   :  { %1447 = vmatprep.subr.bf16.mxu0 %v1446_v38  ;;  %v1475_v38 = vpack.c.bf16 %v957_v37, %v956_v36 }
  0xc0   :  { %1473 = vmatpush3.bf16.msra.mxu1 %v1472_v35 }
  0xc1   :  { %1449 = vmatpush1.bf16.msra.mxu0 %v1448_v43  ;;  %1474 = vmatprep.subr.bf16.mxu1 %v1781_v0  ;;  %v961_v43 = vld [vmem:[#allocation10 + $0x68] sm:$0xff] }
  0xc2   :  { %1451 = vmatprep.subr.bf16.mxu0 %v1450_v44  ;;  %v1481_v44 = vpack.c.bf16 %v961_v43, %v960_v42 }
  0xc4   :  { %1476 = vmatpush3.bf16.msra.mxu1 %v1475_v38 }
  0xc5   :  { %1453 = vmatpush1.bf16.msra.mxu0 %v1452_v47  ;;  %1477 = vmatprep.subr.bf16.mxu1 %v1781_v0  ;;  %v1484_v47 = vpack.c.bf16 %v963_v46, %v962_v45 }
  0xc6   :  { %1455 = vmatprep.subr.bf16.mxu0 %v1454_v50  ;;  %v1044_v50 = vld [vmem:[#allocation11 + $0x10] sm:$0xff] }
  0xc8   :  { %1479 = vmatpush3.bf16.msra.mxu1 %v1478_v41 }
  0xc9   :  { %1457 = vmatpush1.bf16.msra.mxu0 %v1456_v53  ;;  %1480 = vmatprep.subr.bf16.mxu1 %v1781_v0  ;;  %v1490_v53 = vpack.c.bf16 %v1045_v52, %v1044_v50 }
  0xca   :  { %1459 = vmatprep.subr.bf16.mxu0 %v1458_v56  ;;  %v1493_v56 = vpack.c.bf16 %v1047_v55, %v1046_v54 }
  0xcc   :  { %1482 = vmatpush3.bf16.msra.mxu1 %v1481_v44 }
  0xcd   :  { %1461 = vmatpush1.bf16.msra.mxu0 %v1460_v59  ;;  %1483 = vmatprep.subr.bf16.mxu1 %v1781_v0  ;;  %v1496_v59 = vpack.c.bf16 %v1049_v58, %v1048_v57 }
  0xce   :  { %1486 = vmatprep.subr.bf16.mxu0 %v1781_v0 }
  0xd0   :  { %1485 = vmatpush3.bf16.msra.mxu1 %v1484_v47 }
 0x163   :  { %v1254_v4 = vpop.f32.mrb[0].mxu0 }
 0x164   :  { %v1276_v5 = vpop.f32.mrb[0].mxu1  ;;  %v1255_v7 = vpop.f32.mrb[1].mxu0 }
 0x165   :  { %v1277_v8 = vpop.f32.mrb[1].mxu1  ;;  %v1256_v9 = vadd.f32 %v1255_v7, %v1254_v4  ;;  %v1257_v11 = vpop.f32.mrb[2].mxu0  ;;  %v1055_v4 = vld [vmem:[#allocation11 + $0x68] sm:$0xff] }
 0x166   :  { %v1278_v10 = vadd.f32 %v1277_v8, %v1276_v5  ;;  %v1279_v12 = vpop.f32.mrb[2].mxu1  ;;  %v1258_v13 = vpop.f32.mrb[3].mxu0  ;;  %v1505_v5 = vpack.c.bf16 %v1055_v4, %v1054_v3 }
 0x167   :  { %v1280_v14 = vpop.f32.mrb[3].mxu1  ;;  %v701_v15 = vadd.f32 %v1256_v9, %v1163_v6  ;;  %v861_v6 = vlaneseq  ;;  %v859_v9 = vld [vmem:[%s1973_s5] sm:$0x3] }
 0x169   :  { %v741_v16 = vadd.f32 %v1278_v10, %v701_v15  ;;  %v862_v7 = vshrl.u32 %v861_v6, 7 }
 0x16b   :  { %v867_v8 = vsub.s32 1, %v862_v7 }
 0x16d   :  { %v868_v10 = vrot.slane %v859_v9, %v867_v8 }
 0x183   :  { %v1298_v17 = vpop.f32.mrb[4].mxu0 }
 0x184   :  { %v1320_v18 = vpop.f32.mrb[4].mxu1  ;;  %v1299_v19 = vpop.f32.mrb[5].mxu0 }
 0x185   :  { %v1321_v20 = vpop.f32.mrb[5].mxu1  ;;  %v1300_v21 = vadd.f32 %v1299_v19, %v1298_v17  ;;  %v1301_v23 = vpop.f32.mrb[6].mxu0 }
 0x186   :  { %v1322_v22 = vadd.f32 %v1321_v20, %v1320_v18  ;;  %v1323_v24 = vpop.f32.mrb[6].mxu1  ;;  %v1302_v25 = vpop.f32.mrb[7].mxu0  ;;  %v942_v18 = vld [vmem:[#allocation5] sm:$0xff] }
 0x187   :  { %v1324_v26 = vpop.f32.mrb[7].mxu1  ;;  %v781_v27 = vadd.f32 %v1300_v21, %v741_v16  ;;  %v863_v16 = vsub.s32 0, %v862_v7  ;;  %v1057_v23 = vld [vmem:[#allocation11 + $0x78] sm:$0xff] }
 0x188   :  { %v1236_v25 = vld [vmem:[%s1975_s7] ss:$0 sm:$0xff]  ;;  %s1783_s7 = smov [#allocation13]  }
 0x189   :  { %v821_v28 = vadd.f32 %v1322_v22, %v781_v27  ;;  %v864_v17 = vrot.slane %v859_v9, %v863_v16  ;;  %v1056_v22 = vld [vmem:[#allocation11 + $0x70] sm:$0xff]  ;;  %s1151_s29 = sshll.u32 %s1783_s7, 4  ;;  %s1152_s29 = int_to_ptr.vmem [resolvable:$true] %s1151_s29 }
 0x18a   :  { %v1508_v24 = vpack.c.bf16 %v1057_v23, %v1056_v22  ;;  %s1736_s4 = scalar_lea.vmem %s1152_s29, 128  ;;  %p1741_p7 = scmp.lt.s32.totalorder %s1152_s29, %s1152_s29 }
 0x18b   :  { %v826_v29 = vmax.f32 %v821_v28, 0.0  ;;  %p1737_p6 = scmp.ne.s32.totalorder %s1152_s29, %s1736_s4  ;;  %p1742_p8 = scmp.lt.s32.totalorder %s1736_s4, %s1736_s4 }
 0x18d   :  { %936 = vmatmul.mubr.f32.vlgmr.msra.gmra.mrb[8].mxu0 %v826_v29  ;;  %p1743_p9 = por %p1742_p8, %p1741_p7 }
 0x18e   :  { %1427 = vmatprep.mubr.msk.f32.mxu0 %vm1782_vm0, %v1780_v60  ;;  %1488 = vmatpush3.bf16.msra.mxu0 %v1487_v51  ;;  %v1050_v60 = vld [vmem:[#allocation11 + $0x40] sm:$0xff] }
 0x18f   :  { %1489 = vmatprep.subr.bf16.mxu0 %v1781_v0  ;;  %v1499_v62 = vpack.c.bf16 %v1051_v61, %v1050_v60  ;;  %p1744_p10 = pnand %p1743_p9, %p1737_p6 }
 0x192   :  { %1491 = vmatpush3.bf16.msra.mxu0 %v1490_v53 }
 0x193   :  { %1492 = vmatprep.subr.bf16.mxu0 %v1781_v0 }
 0x196   :  { %1494 = vmatpush3.bf16.msra.mxu0 %v1493_v56 }
 0x197   :  { %1495 = vmatprep.subr.bf16.mxu0 %v1781_v0 }
 0x19a   :  { %1497 = vmatpush3.bf16.msra.mxu0 %v1496_v59 }
 0x19b   :  { %1498 = vmatprep.subr.bf16.mxu0 %v1781_v0 }
 0x19e   :  { %1500 = vmatpush3.bf16.msra.mxu0 %v1499_v62 }
 0x19f   :  { %1501 = vmatprep.subr.bf16.mxu0 %v1781_v0 }
 0x1a2   :  { %1503 = vmatpush3.bf16.msra.mxu0 %v1502_v2 }
 0x1a3   :  { %1504 = vmatprep.subr.bf16.mxu0 %v1781_v0 }
 0x1a6   :  { %1506 = vmatpush3.bf16.msra.mxu0 %v1505_v5 }
 0x1a7   :  { %1507 = vmatprep.subr.bf16.mxu0 %v1781_v0 }
 0x1aa   :  { %1509 = vmatpush3.bf16.msra.mxu0 %v1508_v24 }
 0x260   :  { %v937_v11 = vpop.f32.mrb[8].mxu0 }
 0x261   :  { %v939_v12 = vpop.f32.mrb[9].mxu0  ;;  %v938_v20 = vadd.f32 %v937_v11, %v864_v17 }
 0x262   :  { %v940_v13 = vadd.f32 %v939_v12, %v868_v10 }
 0x264   :  { %v943_v14 = vmul.f32 0.5, %v940_v13 }
 0x266   :  { %v944_v15 = vmul.f32 1.442695, %v943_v14 }
 0x268   :  { %1598 = vpow2.f32 %v944_v15 }
 0x272   :  { %v1599_v19 = vpop.eup %1598 }
 0x273   :  { %v946_v0 = vmul.f32 %v1599_v19, %v942_v18 }
 0x275   :  { %v947_v21 = vadd.f32 %v946_v0, %v938_v20 }
 0x277   :  { %1393 = vmatmul.mubr.f32.vlgmr.msra.gmra.mrb[8].mxu1 %v947_v21 }
 0x34a   :  { %v1037_v26 = vpop.f32.mrb[8].mxu1 }
 0x34b   :  { %v1038_v27 = vadd.f32 %v1236_v25, %v1037_v26  ;;  %v1394_v28 = vpop.f32.mrb[9].mxu1 }
 0x34d   :  { %v1041_v29 = vmax.f32 %v1038_v27, 0.0 }
 0x34f   :  { %1428 = vmatmul.mubr.f32.vlgmr.msra.gmra.mrb[10].mxu0 %v1041_v29 }
 0x422   :  { %v1131_v31 = vpop.f32.mrb[10].mxu0 }
 0x423   :  { %v1132_v32 = vadd.f32 %v1237_v30, %v1131_v31  ;;  %v1429_v33 = vpop.f32.mrb[11].mxu0 }
 0x425   :  { %1135 = vmax.xlane.f32.xlu0 %v1132_v32 }
 0x4b2   :  { %v1136_v34 = vpop.xlane.xlu0 %1135 }
 0x4b3   :  { %v1137_v35 = vsub.f32 %v1132_v32, %v1136_v34 }
 0x4b5   :  { %v1138_v36 = vmul.f32 1.442695, %v1137_v35 }
 0x4b7   :  { %1600 = vpow2.f32 %v1138_v36 }
 0x4c1   :  { %v1601_v37 = vpop.eup %1600 }
 0x4c2   :  { %1140 = vadd.xlane.f32.xlu0 %v1601_v37 }
 0x54f   :  { %v1141_v38 = vpop.xlane.xlu0 %1140 }
 0x550   :  { %1602 = vrcp.f32 %v1141_v38 }
 0x55a   :  { %v1603_v39 = vpop.eup %1602 }
 0x55b   :  { %v1143_v40 = vmul.f32 %v1603_v39, %v1601_v37 }
 0x55d   :  { %1144 = vst [vmem:[#allocation13] sm:$0xff] %v1143_v40 }
 0x55e   :  { %1747 = shalt.err (!%p1744_p10)
}
 0x55f   :  { %s1748_s30 = scalar_lea.hbm %s1978_s10, 128 }
 0x560   :  { %p1749_p11 = scmp.ne.s32.totalorder %s1978_s10, %s1748_s30  ;;  %p1752_p12 = scmp.lt.u32.totalorder %s1748_s30, %s1978_s10 }
 0x562   :  { %p1754_p13 = pnand %p1752_p12, %p1749_p11 }
 0x564   :  { %1757 = shalt.err (!%p1754_p13)
}
 0x565   :  { %1154 = dma.vmem_to_hbm [thread:$0]  %s1152_s29, 128, %s1978_s10, [#allocation4]  }
 0x566   :  { %1766 = dma.done.wait [#allocation4], 128  }
 0x567   :  { %1767 = vsyncadd [#allocation4], 4294967168 }
 0x568   :  { %1158 = vsyncpa [#allocation3], 1 }
 0x569   :  { %1159 = vsyncpa [#allocation6], 1 }
 0x56a   :  { %1160 = vsyncpa [#allocation9], 1 }
 0x56b   :  { %1161 = vsyncpa [#allocation12], 1 }
 0x56c   :  { %1162 = vsyncpa [#allocation4], 1 }

</bundles_post_ra>
